<compile_context>
chip_gen: v5e
topology: v5e:2x2
jax: 0.10.0
libtpu: 0.0.40
codegen_flags: <defaults>
</compile_context>

<pallas_src>
import functools

import jax
import jax.numpy as jnp
from jax import lax
from jax.experimental import pallas as pl
from jax.experimental.pallas import tpu as pltpu


def _round_up(x, m):
    return ((x + m - 1) // m) * m


# --------------------------------------------------------------------------
# Kernel
# --------------------------------------------------------------------------
def _ff_kernel(x_ref, w1_ref, b1_ref, w2_ref, b2_ref, o_ref, *, h_chunk,
               tanh_gelu):
    """One (TM, D) row tile: LN (affine pre-folded) -> Linear1 -> GELU ->
    Linear2, with the hidden dim processed in h_chunk-wide interleaved slices
    so MXU (matmuls) and VPU/EUP (GELU) work overlap."""
    x = x_ref[...].astype(jnp.float32)                         # (TM, D)

    # ---- LayerNorm(dim), eps=1e-5 (PyTorch default); affine folded into W1/b1
    mean = jnp.mean(x, axis=-1, keepdims=True)
    xc = x - mean
    var = jnp.mean(xc * xc, axis=-1, keepdims=True)
    xn = (xc * lax.rsqrt(var + 1e-5)).astype(jnp.bfloat16)     # (TM, D) bf16

    hidden = w1_ref.shape[1]
    tm, dim = o_ref.shape
    acc = jnp.zeros((tm, dim), jnp.float32)

    # Static (trace-time unrolled) loop over hidden-dim chunks:
    #   matmul1-slice -> bias + GELU slice -> matmul2 partial accumulate.
    for c0 in range(0, hidden, h_chunk):
        c1 = min(c0 + h_chunk, hidden)
        # Linear1 slice (bf16 operands, f32 accumulation on the MXU).
        h = jnp.dot(xn, w1_ref[:, c0:c1], preferred_element_type=jnp.float32)
        h = h + b1_ref[:, c0:c1].astype(jnp.float32)
        # GELU slice.
        if tanh_gelu:
            # tanh approximation -> EUP slot (cheap); numerics shift ~1e-3.
            h = 0.5 * h * (1.0 + jnp.tanh(
                0.7978845608028654 * (h + 0.044715 * h * h * h)))
        else:
            # Exact erf form: matches torch.nn.GELU() default.
            h = 0.5 * h * (1.0 + lax.erf(h * 0.7071067811865476))
        # ---- Dropout(p=0.0) -> identity ----
        # Linear2 partial accumulate.
        acc = acc + jnp.dot(h.astype(jnp.bfloat16), w2_ref[c0:c1, :],
                            preferred_element_type=jnp.float32)

    acc = acc + b2_ref[...].astype(jnp.float32)
    # ---- Dropout(p=0.0) -> identity ----
    o_ref[...] = acc.astype(o_ref.dtype)


# --------------------------------------------------------------------------
# Wrapper helpers
# --------------------------------------------------------------------------
def prepare_ff_params(gamma, beta, w1, b1, w2, b2):
    """One-time parameter prep (call at init, not per step):
    fold the LayerNorm affine into Linear1 and pre-cast weights to bf16.

    Accepts torch-style 1-D gamma/beta/b1/b2; w1 is (dim, hidden), w2 is
    (hidden, dim) (i.e. transposed relative to torch's Linear.weight)."""
    g = gamma.reshape(-1).astype(jnp.float32)                     # (D,)
    bt = beta.reshape(-1).astype(jnp.float32)                     # (D,)
    w1f = w1.astype(jnp.float32)                                  # (D, H)
    w2f = w2.astype(jnp.float32)                                  # (H, D)
    w1p = (g[:, None] * w1f).astype(jnp.bfloat16)                 # (D, H) bf16
    b1p = bt[None, :] @ w1f + b1.reshape(1, -1).astype(jnp.float32)   # (1, H)
    w2p = w2f.astype(jnp.bfloat16)                                # (H, D) bf16
    b2p = b2.reshape(1, -1).astype(jnp.float32)                   # (1, D)
    return w1p, b1p, w2p, b2p


def _choose_tile(n_rows, block_rows):
    """Row-tile size: 128-aligned full MXU passes when possible, and >= 2 grid
    steps so the 'parallel' row axis can shard across both v7x TensorCores."""
    if n_rows <= 8:
        return 8
    if n_rows < 256:
        # Too small for 128-row tiles: two sublane-aligned steps.
        return _round_up(pl.cdiv(n_rows, 2), 8)
    half = _round_up(pl.cdiv(_round_up(n_rows, 128), 2), 128)
    tm = min(_round_up(block_rows, 128), half)
    return max(tm, 128)


def _vmem_limit_bytes(tm, dim, hidden, h_chunk):
    """Budgeted scoped-VMEM request: actual footprint + margin, capped at ~75%
    of physical VMEM (~48 MiB on v7x, ~96 MiB on v5e/v6e)."""
    mib = 1024 * 1024
    x_out_tiles = 2 * 2 * tm * dim * 4              # double-buffered x + out (f32)
    weights = 2 * 2 * (dim * hidden + hidden * dim)  # double-buffered bf16 w1+w2
    biases = 2 * 4 * (hidden + dim)
    hc = min(h_chunk, hidden)
    live = tm * dim * (2 + 4) + 2 * tm * hc * 4      # xn(bf16) + acc(f32) + h chunk
    budget = x_out_tiles + weights + biases + live + 16 * mib
    phys = None
    try:
        phys = pltpu.get_tpu_info().vmem_capacity_bytes
    except Exception:
        phys = None                                  # info query only; fall back
    cap = (phys * 3) // 4 if phys else 48 * mib
    return int(max(32 * mib, min(budget, cap)))


def _ff_pallas_call(n_rows, tm, dim, hidden, h_chunk, out_dtype, tanh_gelu):
    kernel = functools.partial(_ff_kernel, h_chunk=h_chunk, tanh_gelu=tanh_gelu)
    const = lambda i: (0, 0)   # grid-invariant operands (weights / biases)
    return pl.pallas_call(
        kernel,
        out_shape=jax.ShapeDtypeStruct((n_rows, dim), out_dtype),
        grid_spec=pltpu.PrefetchScalarGridSpec(
            num_scalar_prefetch=0,
            grid=(n_rows // tm,),
            in_specs=[
                pl.BlockSpec((tm, dim), lambda i: (i, 0)),     # x row tile
                pl.BlockSpec((dim, hidden), const),            # w1' (bf16)
                pl.BlockSpec((1, hidden), const),              # b1'
                pl.BlockSpec((hidden, dim), const),            # w2  (bf16)
                pl.BlockSpec((1, dim), const),                 # b2
            ],
            out_specs=pl.BlockSpec((tm, dim), lambda i: (i, 0)),
        ),
        compiler_params=pltpu.CompilerParams(
            # Row tiles are independent -> megacore sharding on v7x.
            dimension_semantics=("parallel",),
            vmem_limit_bytes=_vmem_limit_bytes(tm, dim, hidden, h_chunk),
        ),
    )


def feedforward(x, gamma, beta, w1, b1, w2, b2, *, block_rows=512,
                h_chunk=512, tanh_gelu=False, prepared=None):
    """x: (batch, seq, dim) -> (batch, seq, dim).

    block_rows: max row-tile size. 512 amortizes per-grid-step overhead on
    v5e/v6e (128 MiB VMEM) and still fits the v7x budget with ViT-scale
    weights; the tile chooser shrinks it to keep >= 2 grid steps.
    h_chunk: hidden-dim slice width for MXU/VPU interleaving (512 default).
    prepared: optional result of prepare_ff_params() to skip per-call prep.
    """
    B, S, D = x.shape
    H = w1.shape[1]
    N = B * S

    if prepared is None:
        prepared = prepare_ff_params(gamma, beta, w1, b1, w2, b2)
    w1p, b1p, w2p, b2p = prepared

    tm = _choose_tile(N, block_rows)
    n_pad = _round_up(N, tm)

    x2 = x.reshape(N, D)
    if n_pad != N:
        # Padded zero rows produce finite garbage that is sliced off below.
        x2 = jnp.pad(x2, ((0, n_pad - N), (0, 0)))

    call = _ff_pallas_call(n_pad, tm, D, H, min(h_chunk, H), x.dtype, tanh_gelu)
    out = call(x2, w1p, b1p, w2p, b2p)
    return out[:N].reshape(B, S, D)


# --------------------------------------------------------------------------
# Pure-JAX reference (exact PyTorch semantics, all-f32). The kernel uses bf16
# matmul inputs with f32 accumulation, so tolerances are bf16-level.
# --------------------------------------------------------------------------
def _reference(x, gamma, beta, w1, b1, w2, b2, tanh_gelu=False):
    xf = x.astype(jnp.float32)
    mean = jnp.mean(xf, axis=-1, keepdims=True)
    var = jnp.mean((xf - mean) ** 2, axis=-1, keepdims=True)
    xn = (xf - mean) * lax.rsqrt(var + 1e-5) * gamma.reshape(-1) + beta.reshape(-1)
    h = xn @ w1.astype(jnp.float32) + b1.reshape(-1)
    if tanh_gelu:
        h = 0.5 * h * (1.0 + jnp.tanh(0.7978845608028654 * (h + 0.044715 * h ** 3)))
    else:
        h = 0.5 * h * (1.0 + lax.erf(h * 0.7071067811865476))
    y = h @ w2.astype(jnp.float32) + b2.reshape(-1)
    return y.astype(x.dtype)


if __name__ == "__main__":
    key = jax.random.PRNGKey(0)
    B, S, D, H = 2, 8, 32, 64
    kx, kg, kb, kw1, kb1, kw2, kb2 = jax.random.split(key, 7)

    x = jax.random.normal(kx, (B, S, D), dtype=jnp.float32)
    # Deterministic synthetic parameters, torch-style 1-D vectors where torch
    # uses 1-D (LayerNorm weight/bias, Linear bias). w1/w2 are (in, out).
    gamma = jnp.ones((D,), jnp.float32) + 0.01 * jax.random.normal(kg, (D,))
    beta = 0.01 * jax.random.normal(kb, (D,), dtype=jnp.float32)
    w1 = jax.random.normal(kw1, (D, H), dtype=jnp.float32) / jnp.sqrt(D)
    b1 = 0.01 * jax.random.normal(kb1, (H,), dtype=jnp.float32)
    w2 = jax.random.normal(kw2, (H, D), dtype=jnp.float32) / jnp.sqrt(H)
    b2 = 0.01 * jax.random.normal(kb2, (D,), dtype=jnp.float32)

    # One-time parameter prep (LN-affine fold + bf16 weight cast).
    prepared = prepare_ff_params(gamma, beta, w1, b1, w2, b2)

    # Default (exact-erf GELU); N=16 rows -> two 8-row grid steps, exercising
    # the pipelined multi-step "parallel" grid path.
    out = feedforward(x, gamma, beta, w1, b1, w2, b2, prepared=prepared)
    # tanh-approx GELU path (EUP), checked against its own reference.
    out_tanh = feedforward(x, gamma, beta, w1, b1, w2, b2, prepared=prepared,
                           tanh_gelu=True)
    jax.block_until_ready((out, out_tanh))

    ref = _reference(x, gamma, beta, w1, b1, w2, b2)
    ref_tanh = _reference(x, gamma, beta, w1, b1, w2, b2, tanh_gelu=True)

    assert out.shape == (B, S, D)
    assert out_tanh.shape == (B, S, D)
    assert jnp.allclose(out, ref, atol=2e-2, rtol=2e-2), "mismatch vs reference"
    assert jnp.allclose(out_tanh, ref_tanh, atol=2e-2, rtol=2e-2), \
        "tanh-GELU mismatch vs reference"
    print("KERNEL_OK")
</pallas_src>

<mosaic_0001>
module attributes {stable_mosaic.version = 11 : i64} {
  func.func @_ff_kernel(%arg0: i32, %arg1: memref<8x32xf32, #tpu.memory_space<vmem>>, %arg2: memref<32x64xbf16, #tpu.memory_space<vmem>>, %arg3: memref<1x64xf32, #tpu.memory_space<vmem>>, %arg4: memref<64x32xbf16, #tpu.memory_space<vmem>>, %arg5: memref<1x32xf32, #tpu.memory_space<vmem>>, %arg6: memref<8x32xf32, #tpu.memory_space<vmem>>) attributes {dimension_semantics = [#tpu.dimension_semantics<parallel>], iteration_bounds = array<i64: 2>, scalar_prefetch = 0 : i64, scratch_operands = 0 : i64, tpu.core_type = #tpu.core_type<tc>, window_params = [{transform_indices = @transform_0, window_bounds = array<i64: 8, 32>}, {pipeline_mode = #tpu.pipeline_mode<synchronous>, transform_indices = @transform_1, window_bounds = array<i64: 32, 64>}, {pipeline_mode = #tpu.pipeline_mode<synchronous>, transform_indices = @transform_2, window_bounds = array<i64: 1, 64>}, {pipeline_mode = #tpu.pipeline_mode<synchronous>, transform_indices = @transform_3, window_bounds = array<i64: 64, 32>}, {pipeline_mode = #tpu.pipeline_mode<synchronous>, transform_indices = @transform_4, window_bounds = array<i64: 1, 32>}, {transform_indices = @transform_5, window_bounds = array<i64: 8, 32>}]} {
    %c0 = arith.constant 0 : index
    %c0_0 = arith.constant 0 : index
    %0 = vector.load %arg1[%c0, %c0_0] : memref<8x32xf32, #tpu.memory_space<vmem>>, vector<8x32xf32>
    %cst = arith.constant dense<0.000000e+00> : vector<8xf32>
    %1 = vector.multi_reduction <add>, %0, %cst [1] : vector<8x32xf32> to vector<8xf32>
    %2 = vector.shape_cast %1 : vector<8xf32> to vector<8x1xf32>
    %cst_1 = arith.constant 3.200000e+01 : f32
    %3 = vector.broadcast %cst_1 : f32 to vector<8x1xf32>
    %4 = arith.divf %2, %3 : vector<8x1xf32>
    %5 = vector.broadcast %4 : vector<8x1xf32> to vector<8x32xf32>
    %6 = arith.subf %0, %5 : vector<8x32xf32>
    %7 = arith.mulf %6, %6 : vector<8x32xf32>
    %cst_2 = arith.constant dense<0.000000e+00> : vector<8xf32>
    %8 = vector.multi_reduction <add>, %7, %cst_2 [1] : vector<8x32xf32> to vector<8xf32>
    %9 = vector.shape_cast %8 : vector<8xf32> to vector<8x1xf32>
    %cst_3 = arith.constant 3.200000e+01 : f32
    %10 = vector.broadcast %cst_3 : f32 to vector<8x1xf32>
    %11 = arith.divf %9, %10 : vector<8x1xf32>
    %cst_4 = arith.constant 9.99999974E-6 : f32
    %12 = vector.broadcast %cst_4 : f32 to vector<8x1xf32>
    %13 = arith.addf %11, %12 : vector<8x1xf32>
    %14 = math.rsqrt %13 : vector<8x1xf32>
    %15 = vector.broadcast %14 : vector<8x1xf32> to vector<8x32xf32>
    %16 = arith.mulf %6, %15 : vector<8x32xf32>
    %17 = arith.truncf %16 : vector<8x32xf32> to vector<8x32xbf16>
    %cst_5 = arith.constant 0.000000e+00 : f32
    %18 = vector.broadcast %cst_5 : f32 to vector<8x32xf32>
    %c0_6 = arith.constant 0 : index
    %c0_7 = arith.constant 0 : index
    %19 = vector.load %arg2[%c0_6, %c0_7] : memref<32x64xbf16, #tpu.memory_space<vmem>>, vector<32x64xbf16>
    %cst_8 = arith.constant dense<0.000000e+00> : vector<8x64xf32>
    %20 = tpu.matmul %17, %19, %cst_8 {dimension_numbers = #tpu.dot_dimension_numbers<[1], [0], [0], [1], [0, 0, 1, 1], [], []>} : vector<8x32xbf16>, vector<32x64xbf16>, vector<8x64xf32> -> vector<8x64xf32>
    %c0_9 = arith.constant 0 : index
    %c0_10 = arith.constant 0 : index
    %21 = vector.load %arg3[%c0_9, %c0_10] : memref<1x64xf32, #tpu.memory_space<vmem>>, vector<1x64xf32>
    %22 = vector.broadcast %21 : vector<1x64xf32> to vector<8x64xf32>
    %23 = arith.addf %20, %22 : vector<8x64xf32>
    %cst_11 = arith.constant 5.000000e-01 : f32
    %24 = vector.broadcast %cst_11 : f32 to vector<8x64xf32>
    %25 = arith.mulf %24, %23 : vector<8x64xf32>
    %cst_12 = arith.constant 0.707106769 : f32
    %26 = vector.broadcast %cst_12 : f32 to vector<8x64xf32>
    %27 = arith.mulf %23, %26 : vector<8x64xf32>
    %28 = math.erf %27 : vector<8x64xf32>
    %cst_13 = arith.constant 1.000000e+00 : f32
    %29 = vector.broadcast %cst_13 : f32 to vector<8x64xf32>
    %30 = arith.addf %29, %28 : vector<8x64xf32>
    %31 = arith.mulf %25, %30 : vector<8x64xf32>
    %32 = arith.truncf %31 : vector<8x64xf32> to vector<8x64xbf16>
    %c0_14 = arith.constant 0 : index
    %c0_15 = arith.constant 0 : index
    %33 = vector.load %arg4[%c0_14, %c0_15] : memref<64x32xbf16, #tpu.memory_space<vmem>>, vector<64x32xbf16>
    %cst_16 = arith.constant dense<0.000000e+00> : vector<8x32xf32>
    %34 = tpu.matmul %32, %33, %cst_16 {dimension_numbers = #tpu.dot_dimension_numbers<[1], [0], [0], [1], [0, 0, 1, 1], [], []>} : vector<8x64xbf16>, vector<64x32xbf16>, vector<8x32xf32> -> vector<8x32xf32>
    %35 = arith.addf %18, %34 : vector<8x32xf32>
    %c0_17 = arith.constant 0 : index
    %c0_18 = arith.constant 0 : index
    %36 = vector.load %arg5[%c0_17, %c0_18] : memref<1x32xf32, #tpu.memory_space<vmem>>, vector<1x32xf32>
    %37 = vector.broadcast %36 : vector<1x32xf32> to vector<8x32xf32>
    %38 = arith.addf %35, %37 : vector<8x32xf32>
    %c0_19 = arith.constant 0 : index
    %c0_20 = arith.constant 0 : index
    %39 = vector.load %arg6[%c0_19, %c0_20] : memref<8x32xf32, #tpu.memory_space<vmem>>, vector<8x32xf32>
    tpu.vector_store %arg6[%c0_19, %c0_20], %38 {strides = array<i32>} : memref<8x32xf32, #tpu.memory_space<vmem>>, vector<8x32xf32>,
    return
  }
  func.func @transform_0(%arg0: i32) -> (i32, i32) {
    %c0_i32 = arith.constant 0 : i32
    %c0_i32_0 = arith.constant 0 : i32
    return %arg0, %c0_i32 : i32, i32
  }
  func.func @transform_1(%arg0: i32) -> (i32, i32) {
    %c0_i32 = arith.constant 0 : i32
    %c0_i32_0 = arith.constant 0 : i32
    %c0_i32_1 = arith.constant 0 : i32
    return %c0_i32, %c0_i32_0 : i32, i32
  }
  func.func @transform_2(%arg0: i32) -> (i32, i32) {
    %c0_i32 = arith.constant 0 : i32
    %c0_i32_0 = arith.constant 0 : i32
    %c0_i32_1 = arith.constant 0 : i32
    return %c0_i32, %c0_i32_0 : i32, i32
  }
  func.func @transform_3(%arg0: i32) -> (i32, i32) {
    %c0_i32 = arith.constant 0 : i32
    %c0_i32_0 = arith.constant 0 : i32
    %c0_i32_1 = arith.constant 0 : i32
    return %c0_i32, %c0_i32_0 : i32, i32
  }
  func.func @transform_4(%arg0: i32) -> (i32, i32) {
    %c0_i32 = arith.constant 0 : i32
    %c0_i32_0 = arith.constant 0 : i32
    %c0_i32_1 = arith.constant 0 : i32
    return %c0_i32, %c0_i32_0 : i32, i32
  }
  func.func @transform_5(%arg0: i32) -> (i32, i32) {
    %c0_i32 = arith.constant 0 : i32
    %c0_i32_0 = arith.constant 0 : i32
    return %arg0, %c0_i32 : i32, i32
  }
}

</mosaic_0001>

<bundles_post_ra>
// kernel: tpu_custom_call.1
= control target key start
LH: loop header
LB: loop body
LE: loop exit
PB: predicated region body
PF: predicated region fallthrough
CT: control target
= control target key end

     0   :  { %10 = vsyncpa [#allocation3], 0  ;;  %s762_s0 = inlined_call_operand.vmem [shape: f32[16,32], index: 0, kind: input, shape index: {}]   ;;  %s763_s1 = inlined_call_operand.vmem [shape: bf16[32,64], index: 1, kind: input, shape index: {}]   ;;  %s764_s2 = inlined_call_operand.vmem [shape: f32[1,64], index: 2, kind: input, shape index: {}]   ;;  %s765_s3 = inlined_call_operand.vmem [shape: bf16[64,32], index: 3, kind: input, shape index: {}]   ;;  %s766_s4 = inlined_call_operand.vmem [shape: f32[1,32], index: 4, kind: input, shape index: {}]   ;;  %s767_s5 = inlined_call_operand.hbm [shape: f32[16,32], index: 5, kind: output, shape index: {}]  }
   0x1   :  { %12 = vsyncpa [#allocation3 + $0x1], 0  ;;  %s649_s18 = smov 0   ;;  %s651_s19 = smov 0  }
   0x2   :  { %s653_s20 = smov 0   ;;  %s655_s21 = smov 0  }
   0x3 LB: > { %s670_s22 = sadd.s32 4294967295, %s616_s21   ;;  %s463_s23 = sadd.s32 4294967294, %s616_s21   ;;  %s616_s21 = sphi %s655_s21, %s773_s21   ;;  %s612_s20 = sphi %s653_s20, %s772_s20   ;;  %s608_s19 = sphi %s651_s19, %s771_s19   ;;  %s604_s18 = sphi %s649_s18, %s770_s18  }
   0x4   : > { %s674_s24 = sadd.s32 1, %s616_s21   ;;  %s135_s25 = sadd.s32 1, %s612_s20 }
   0x5   : > { %s132_s26 = ssub.s32 %s616_s21, %s674_s24  ;;  %p145_p0 = scmp.ne.s32.totalorder %s612_s20, %s608_s19 }
   0x6   : > { %p133_p1 = scmp.eq.s32.totalorder %s132_s26, 0  ;;  %p146_p2 = scmp.eq.s32.totalorder %s670_s22, 1 }
   0x7   : > { %p151_p3 = scmp.ne.s32.totalorder %s608_s19, %s604_s18  ;;  %p152_p4 = scmp.eq.s32.totalorder %s463_s23, 1 }
   0x8   : > { %s685_s27 = scalar_select %p133_p1, %s612_s20, %s135_s25  }
   0x9   : > { %p687_p5 = por %p146_p2, %p145_p0  ;;  %p691_p6 = por %p152_p4, %p151_p3 }
   0xa   : > { %p466_p7 = scmp.ge.s32.totalorder %s616_s21, 1  ;;  %p189_p8 = scmp.lt.s32.totalorder %s616_s21, 3 }
   0xc   : > { %p190_p9 = pnand %p466_p7, %p189_p8 }
   0xd   : > { %p216_p10 = scmp.lt.s32.totalorder (!%p190_p9), %s670_s22, 1  ;;  %s213_s8 = sand.u32 (!%p190_p9), 1, %s608_s19  }
   0xe   : > { %193 = sbr.rel (%p190_p9) target bundleno = 605 (0x25d), region = 40  ;;  %s467_s10 = sshll.u32 (!%p190_p9), %s213_s8, 3 }
   0xf   : > { %s215_s16 = scalar_lea.vmem (!%p190_p9), [#allocation2], %s467_s10  ;;  %s574_s7 = scalar_lea.hbm (!%p190_p9), %s767_s5, 16 }
  0x10   : > { %s401_s17 = sshll.u32 (!%p190_p9), %s215_s16, 4  ;;  %s402_s17 = int_to_ptr.vmem [resolvable:$true] %s401_s17 }
  0x13   : > { %s217_s30 = scalar_select %p216_p10, %s670_s22, 1  ;;  %vm222_vm0 = vcmask 261120   ;;  %v618_v2 = vmov 32.0   ;;  %v501_v14 = vld [vmem:[%s763_s1 + $0x8] sm:$0xff]  ;;  %v500_v15 = vld [vmem:[%s763_s1] sm:$0xff]  ;;  %v505_v35 = vld [vmem:[%s765_s3 + $0x18] sm:$0xff] }
  0x14   : > { %548 = vrcp.f32 %v618_v2  ;;  %282 = vmatpush.bf16.msra.mxu0 %v501_v14  ;;  %v546_v28 = vld [vmem:[%s764_s2] ss:$0 sm:$0xff]  ;;  %378 = vmatpush.bf16.msra.mxu1 %v505_v35  ;;  %v504_v40 = vld [vmem:[%s765_s3 + $0x10] sm:$0xff]  ;;  %v503_v43 = vld [vmem:[%s765_s3 + $0x8] sm:$0xff]  ;;  %vm370_vm9 = vcmask 523264  }
  0x15   : > { %s468_s6 = sshll.u32 %s217_s30, 3  ;;  %v502_v47 = vld [vmem:[%s765_s3] sm:$0xff] }
  0x16   : > { %s219_s9 = scalar_lea.vmem %s762_s0, %s468_s6 }
  0x17   : > { %v221_v0 = vld [vmem:[%s219_s9] sm:$0xff]  ;;  %s497_s9 = sshll.u32 %s670_s22, 3  ;;  %s389_s22 = scalar_lea.sflag [#allocation3], %s213_s8 }
  0x18   : > { %v223_v1 = vsel %vm222_vm0, %v221_v0, 0.0  ;;  %283 = vmatpush.bf16.msra.mxu0 %v500_v15  ;;  %379 = vmatpush.bf16.msra.mxu1 %v504_v40  ;;  %s399_s13 = scalar_lea.hbm %s767_s5, %s497_s9 }
  0x19   : > { %224 = vadd.xlane.f32.xlu0 %v223_v1  ;;  %s403_s23 = sshll.u32 %s399_s13, 4  ;;  %s404_s23 = int_to_ptr.hbm [resolvable:$true] %s403_s23 }
  0x1a   : > { %v549_v3 = vpop.eup %548  ;;  %s568_s25 = sshra.s32 %s404_s23, 4  ;;  %s569_s25 = int_to_ptr.hbm [resolvable:$true] %s568_s25 }
  0x1b   : > { %v227_v4 = vmul.f32 32.0, %v549_v3  ;;  %vm231_vm1 = vweird.f32 %v549_v3  ;;  %s570_s26 = scalar_lea.hbm %s569_s25, 8  ;;  %p575_p0 = scmp.lt.s32.totalorder %s569_s25, %s767_s5 }
  0x1c   : > { %380 = vmatpush.bf16.msra.mxu1 %v503_v43  ;;  %p571_p11 = scmp.ne.s32.totalorder %s569_s25, %s570_s26  ;;  %p576_p1 = scmp.lt.s32.totalorder %s574_s7, %s570_s26 }
  0x1d   : > { %v228_v5 = vsub.f32 1.0, %v227_v4 }
  0x1e   : > { %p572_p12 = pnand %p571_p11, %p687_p5  ;;  %p577_p2 = por %p576_p1, %p575_p0 }
  0x1f   : > { %v229_v6 = vmul.f32 %v549_v3, %v228_v5 }
  0x20   : > { %381 = vmatpush.bf16.msra.mxu1 %v502_v47  ;;  %p573_p13 = pneg %p572_p12 }
  0x21   : > { %v230_v7 = vadd.f32 %v549_v3, %v229_v6 }
  0x22   : > { %p578_p3 = pnand %p577_p2, %p573_p13 }
  0x23   : > { %v232_v8 = vsel %vm231_vm1, %v549_v3, %v230_v7 }
  0x8c   : > { %v225_v9 = vpop.xlane.xlu0 %224 }
  0x8d   : > { %v233_v10 = vmul.f32 %v232_v8, %v225_v9 }
  0x8f   : > { %v234_v11 = vsub.f32 %v221_v0, %v233_v10 }
  0x91   : > { %v235_v12 = vmul.f32 %v234_v11, %v234_v11 }
  0x93   : > { %v236_v13 = vsel %vm222_vm0, %v235_v12, 0.0  ;;  %v547_v12 = vld [vmem:[%s766_s4] ss:$0 sm:$0xff] }
  0x94   : > { %237 = vadd.xlane.f32.xlu0 %v236_v13 }
 0x107   : > { %v238_v16 = vpop.xlane.xlu0 %237 }
 0x108   : > { %v239_v17 = vmul.f32 %v238_v16, %v232_v8 }
 0x10a   : > { %v240_v18 = vadd.f32 1e-05, %v239_v17 }
 0x10c   : > { %550 = vrsqrt.f32 %v240_v18  ;;  %vm247_vm3 = vweird.f32 %v240_v18 }
 0x112   : > { %v551_v19 = vpop.eup %550 }
 0x113   : > { %v242_v20 = vmul.f32 %v551_v19, %v240_v18  ;;  %vm248_vm2 = vweird.f32 %v551_v19 }
 0x114   : > { %vm249_vm4 = vmor %vm247_vm3, %vm248_vm2 }
 0x115   : > { %v243_v21 = vmul.f32 %v551_v19, %v242_v20 }
 0x117   : > { %v244_v22 = vmul.f32 0.5, %v243_v21 }
 0x119   : > { %v245_v23 = vsub.f32 1.5, %v244_v22 }
 0x11b   : > { %v246_v24 = vmul.f32 %v551_v19, %v245_v23 }
 0x11d   : > { %v250_v25 = vsel %vm249_vm4, %v551_v19, %v246_v24 }
 0x11e   : > { %v251_v26 = vmul.f32 %v250_v25, %v234_v11 }
 0x120   : > { %v252_v27 = vpack.c.bf16 %v251_v26, %v251_v26 }
 0x122   : > { %477 = vmatmul.msk.bf16.vlgmr.msra.gmra.mxu0 %vm222_vm0, %v252_v27 }
 0x19f   : > { %v285_v29 = vpop.f32.mrf.mxu0 }
 0x1a0   : > { %v286_v30 = vadd.f32 %v546_v28, %v285_v29 }
 0x1a2   : > { %v290_v31 = vmul.f32 0.70710677, %v286_v30  ;;  %v289_v8 = vmul.f32 0.5, %v286_v30 }
 0x1a4   : > { %v291_v32 = vmul.f32 %v290_v31, %v290_v31 }
 0x1a6   : > { %v292_v33 = vmin.f32 %v291_v32, 16.0 }
 0x1a7   : > { %v287_v34 = vpop.f32.mrf.mxu0 }
 0x1a8   : > { %v293_v36 = vmul.f32 2.1237322e-06, %v292_v33  ;;  %v304_v37 = vmul.f32 3.8918573e-05, %v292_v33 }
 0x1aa   : > { %v294_v38 = vadd.f32 0.00028619796, %v293_v36  ;;  %v305_v39 = vadd.f32 0.001143296, %v304_v37 }
 0x1ac   : > { %v295_v41 = vmul.f32 %v294_v38, %v292_v33  ;;  %v306_v42 = vmul.f32 %v305_v39, %v292_v33 }
 0x1ae   : > { %v307_v44 = vadd.f32 0.014752088, %v306_v42  ;;  %v296_v45 = vadd.f32 0.0036580483, %v295_v41 }
 0x1b0   : > { %v308_v46 = vmul.f32 %v307_v44, %v292_v33  ;;  %v297_v49 = vmul.f32 %v296_v45, %v292_v33 }
 0x1b2   : > { %v309_v48 = vadd.f32 0.112945676, %v308_v46  ;;  %v298_v52 = vadd.f32 0.05243302, %v297_v49 }
 0x1b4   : > { %v310_v50 = vmul.f32 %v309_v48, %v292_v33  ;;  %v299_v55 = vmul.f32 %v298_v52, %v292_v33 }
 0x1b6   : > { %v311_v51 = vadd.f32 0.4994258, %v310_v50  ;;  %v300_v56 = vadd.f32 0.18741608, %v299_v55 }
 0x1b8   : > { %v312_v53 = vmul.f32 %v311_v51, %v292_v33  ;;  %v301_v58 = vmul.f32 %v300_v56, %v292_v33 }
 0x1ba   : > { %v313_v54 = vadd.f32 1.0, %v312_v53  ;;  %v302_v62 = vadd.f32 1.1283791, %v301_v58 }
 0x1bc   : > { %552 = vrcp.f32 %v313_v54  ;;  %v325_v61 = vand.u32 2147483648, %v313_v54  ;;  %v323_v0 = vand.u32 2147483647, %v313_v54  ;;  %vm319_vm6 = vweird.f32 %v313_v54 }
 0x1bd   : > { %v303_v3 = vmul.f32 %v302_v62, %v290_v31 }
 0x1be   : > { %v326_v2 = vor.u32 1.1754944e-38, %v325_v61  ;;  %vm324_vm8 = vcmp.eq.f32.partialorder %v323_v0, 8.507059e+37 }
 0x1c2   : > { %v553_v57 = vpop.eup %552 }
 0x1c3   : > { %v315_v59 = vmul.f32 %v553_v57, %v313_v54  ;;  %vm320_vm5 = vweird.f32 %v553_v57 }
 0x1c4   : > { %vm321_vm7 = vmor %vm319_vm6, %vm320_vm5 }
 0x1c5   : > { %v316_v60 = vsub.f32 1.0, %v315_v59 }
 0x1c7   : > { %v317_v63 = vmul.f32 %v553_v57, %v316_v60 }
 0x1c9   : > { %v318_v1 = vadd.f32 %v553_v57, %v317_v63 }
 0x1cb   : > { %v322_v4 = vsel %vm321_vm7, %v553_v57, %v318_v1 }
 0x1cc   : > { %v327_v5 = vsel %vm324_vm8, %v326_v2, %v322_v4 }
 0x1cd   : > { %v328_v6 = vmul.f32 %v327_v5, %v303_v3 }
 0x1cf   : > { %v478_v7 = vclamps-f32 %v328_v6, 1.0 }
 0x1d1   : > { %v331_v9 = vadd.f32 1.0, %v478_v7 }
 0x1d3   : > { %v332_v10 = vmul.f32 %v331_v9, %v289_v8 }
 0x1d5   : > { %v333_v11 = vpack.c.bf16 %v332_v10, %v332_v10 }
 0x1d7   : > { %495 = vmatmul.msk.bf16.vlgmr.msra.gmra.mxu1 %vm370_vm9, %v333_v11 }
 0x254   : > { %v383_v13 = vpop.f32.mrf.mxu1 }
 0x255   : > { %v384_v14 = vadd.f32 %v547_v12, %v383_v13 }
 0x257   : > { %387 = vst.msk [vmem:[%s215_s16] sm:$0xff] %vm222_vm0, %v384_v14 }
 0x258   : > { %581 = shalt.err (!%p578_p3)
}
 0x259   : > { %506 = dma.vmem_to_hbm [thread:$0]  (%p687_p5), %s402_s17, 128, %s404_s23, %s389_s22  }
 0x25c   : > { %v385_v15 = vpop.f32.mrf.mxu1 }
 0x25d PF: > { %p512_p4 = scmp.ge.s32.totalorder %s616_s21, 2  ;;  %s415_s8 = sand.u32 1, %s604_s18  }
 0x25e   : > { %s416_s11 = scalar_lea.sflag [#allocation3], %s415_s8 }
 0x25f   : > { %p509_p7 = pnand %p512_p4, %p691_p6 }
 0x261   : > { %p510_p8 = pneg %p509_p7 }
 0x263   : > { %599 = dma.done.wait (%p510_p8), %s416_s11, 128  }
 0x264   : > { %601 = vsyncadd (%p510_p8), %s416_s11, 4294967168  ;;  %p15_p9 = scmp.ge.s32.totalorder %s674_s24, 4   ;;  %s770_s18 = smov %s608_s19 }
 0x265   : > { %s771_s19 = smov %s612_s20  ;;  %s772_s20 = smov %s685_s27 }
 0x266   : > { %s773_s21 = smov %s674_s24  ;;  %17 = sbr.rel (!%p15_p9) target bundleno = 3 (0x3), region = 75 }
 0x26b   :  { %422 = vsyncpa [#allocation3], 1 }
 0x26c   :  { %424 = vsyncpa [#allocation3 + $0x1], 1 }

</bundles_post_ra>
